<compile_context>
chip_gen: v7x
topology: tpu7x:2x2x1
jax: 0.10.0
libtpu: 0.0.40
codegen_flags: <defaults>
</compile_context>

<pallas_src>
import jax
import jax.numpy as jnp
import numpy as np
from jax.experimental import pallas as pl
from jax.experimental.pallas import tpu as pltpu

EPS = 1e-5     # nn.BatchNorm2d default eps
LANE = 128


def _double_conv_kernel(x_ref, m1_ref, m2_ref, gath_ref, scat_ref,
                        g1_ref, be1_ref, g2_ref, be2_ref,
                        out_ref, xpad_ref, ypad_ref):
    """Conv3x3 -> BN(batch stats) -> ReLU, twice; each conv is ONE banded-Toeplitz matmul.

    x_ref    : (N, H, W*Cin)     bf16 input rows (lane layout: W major, Cin minor)
    m1_ref   : (K1pad, W*Cout)   bf16 conv1 ky-stacked banded weights (zero rows in K pad)
    m2_ref   : (K2pad, W*Cout)   bf16 conv2 ky-stacked banded weights
    gath_ref : (W*Cout, Cout)    f32 0/1 matrix summing the W lane groups per channel
    scat_ref : (Cout, W*Cout)    f32 transpose of gath (per-channel -> per-lane broadcast)
    g*/be*   : (1, Cout)         f32 BatchNorm affine parameters
    out_ref  : (N*H, W*Cout)     f32 lane-dense output
    xpad_ref : (N, H, K1pad)     bf16 im2row-over-ky scratch for conv1
    ypad_ref : (N, H, K2pad)     bf16 im2row-over-ky scratch for conv2
    """
    n, h, wcin = x_ref.shape
    nh, wcout = out_ref.shape
    k1pad = xpad_ref.shape[-1]
    k2pad = ypad_ref.shape[-1]
    cout = gath_ref.shape[1]
    w = wcout // cout
    inv_cnt = 1.0 / float(n * h * w)

    def bn_relu(acc, gamma_ref, beta_ref):
        # Training-mode BN (conv bias folded away), single-pass stats; channel reductions
        # batched into one (2, W*C)@(W*C, C) dot and one (2, C)@(C, W*C) dot (f32, tiny M).
        s1 = jnp.sum(acc, axis=0, keepdims=True)                 # (1, W*C)
        s2 = jnp.sum(acc * acc, axis=0, keepdims=True)           # (1, W*C)
        stats = jnp.dot(jnp.concatenate([s1, s2], axis=0), gath_ref[...],
                        preferred_element_type=jnp.float32) * inv_cnt   # (2, C)
        mean = stats[0:1]
        var = stats[1:2] - mean * mean
        scale_c = gamma_ref[...] * jax.lax.rsqrt(var + EPS)      # (1, C)
        shift_c = beta_ref[...] - mean * scale_c                 # (1, C)
        ss = jnp.dot(jnp.concatenate([scale_c, shift_c], axis=0), scat_ref[...],
                     preferred_element_type=jnp.float32)         # (2, W*C)
        return jnp.maximum(acc * ss[0:1] + ss[1:2], 0.0)

    def fill_im2row(pad_ref, rows_f32, blk, kpad):
        # pad_ref[:, hh, ky*blk:(ky+1)*blk] = rows[:, hh+ky-1, :]   (zero outside [0, H)).
        # Halo handling is done on f32 values; the bf16 cast happens right at the store.
        zrow = jnp.zeros((n, 1, blk), jnp.float32)
        top = jnp.concatenate([zrow, rows_f32[:, :h - 1, :]], axis=1)   # row h-1
        bot = jnp.concatenate([rows_f32[:, 1:, :], zrow], axis=1)       # row h+1
        pad_ref[:, :, 0 * blk:1 * blk] = top.astype(pad_ref.dtype)
        pad_ref[:, :, 1 * blk:2 * blk] = rows_f32.astype(pad_ref.dtype)
        pad_ref[:, :, 2 * blk:3 * blk] = bot.astype(pad_ref.dtype)
        if kpad > 3 * blk:   # zero the K-alignment pad columns (matched by zero weight rows)
            pad_ref[:, :, 3 * blk:] = jnp.zeros((n, h, kpad - 3 * blk), pad_ref.dtype)

    # ---------------- conv1: single K=K1pad bf16 MXU matmul ----------------
    fill_im2row(xpad_ref, x_ref[...].astype(jnp.float32), wcin, k1pad)
    acc1 = jnp.dot(xpad_ref[...].reshape(nh, k1pad), m1_ref[...],
                   preferred_element_type=jnp.float32)           # (N*H, W*Cout) f32
    y = bn_relu(acc1, g1_ref, be1_ref)

    # ---- conv2: bn_relu output goes straight into the concatenated-layout ypad ----
    fill_im2row(ypad_ref, y.reshape(n, h, wcout), wcout, k2pad)
    acc2 = jnp.dot(ypad_ref[...].reshape(nh, k2pad), m2_ref[...],
                   preferred_element_type=jnp.float32)
    out_ref[...] = bn_relu(acc2, g2_ref, be2_ref)                # lane-dense unmasked store


def _round_up(x, m):
    return ((x + m - 1) // m) * m


def _band_matrix_np(w_hwio, width, k_pad):
    """ky-stacked banded block-Toeplitz matrix (numpy, host-side, computed once).

    result[(ky*W + wi)*Cin + ci, wo*Cout + co] = sum_kx [wi == wo + kx - 1] * w[ky,kx,ci,co]
    Width-edge zero padding is folded into the band; rows beyond 3*W*Cin are zero (K pad).
    """
    wnp = np.asarray(w_hwio, np.float32)
    kh, kw, cin, cout = wnp.shape
    blocks = []
    for ky in range(kh):
        m = np.zeros((width * cin, width * cout), np.float32)
        for kx in range(kw):
            d = np.eye(width, k=1 - kx, dtype=np.float32)   # d[wi, wo] = [wi == wo + kx - 1]
            m += np.kron(d, wnp[ky, kx])
        blocks.append(m)
    m_all = np.concatenate(blocks, axis=0)                   # (3*W*Cin, W*Cout)
    if k_pad > m_all.shape[0]:
        m_all = np.pad(m_all, ((0, k_pad - m_all.shape[0]), (0, 0)))
    return m_all


def prepare_block_params(params, width):
    """One-time host-side (numpy) preprocessing of module parameters into the kernel's
    banded / gather constants.  Do this at model-load time, not per forward call."""
    w1, b1, g1, be1, w2, b2, g2, be2 = params
    del b1, b2     # conv biases cancel exactly under training-mode BatchNorm
    cin, cout = int(w1.shape[2]), int(w1.shape[3])
    k1pad = _round_up(3 * width * cin, LANE)
    k2pad = _round_up(3 * width * cout, LANE)
    m1 = jnp.asarray(_band_matrix_np(w1, width, k1pad), jnp.bfloat16)   # (K1pad, W*Cout)
    m2 = jnp.asarray(_band_matrix_np(w2, width, k2pad), jnp.bfloat16)   # (K2pad, W*Cout)
    gath_np = (np.arange(width * cout)[:, None] % cout ==
               np.arange(cout)[None, :]).astype(np.float32)             # (W*Cout, Cout)
    r2 = lambda v: jnp.asarray(np.asarray(v, np.float32).reshape(1, cout))
    return dict(m1=m1, m2=m2, gath=jnp.asarray(gath_np), scat=jnp.asarray(gath_np.T),
                g1=r2(g1), be1=r2(be1), g2=r2(g2), be2=r2(be2),
                cin=cin, cout=cout, width=width, k1pad=k1pad, k2pad=k2pad)


def double_conv_block_nhwc(x_nhwc, prep):
    """NHWC in, NHWC out (preferred entry; keeps the surrounding model transpose-free)."""
    n, h, wd, cin = x_nhwc.shape
    assert wd == prep['width'] and cin == prep['cin']
    cout = prep['cout']
    wcin, wcout = wd * cin, wd * cout
    k1pad, k2pad = prep['k1pad'], prep['k2pad']

    # bf16 MXU operands; BN / ReLU math stays f32 inside the kernel.
    x2d = x_nhwc.astype(jnp.bfloat16).reshape(n, h, wcin)

    # Explicit VMEM budget (band weights + input + im2row scratches + output, with margin).
    est = (2 * n * h * wcin                        # bf16 input
           + 2 * (k1pad + k2pad) * wcout           # bf16 band weights
           + 4 * (2 * wcout * cout + 4 * cout)     # f32 gather/scatter + affine params
           + 2 * n * h * (k1pad + k2pad)           # bf16 im2row scratches
           + 4 * n * h * wcout)                    # f32 output
    vmem_limit = int(min(max(4 * est, 8 << 20), 48 << 20))

    vmem = pl.BlockSpec(memory_space=pltpu.MemorySpace.VMEM)
    out2d = pl.pallas_call(
        _double_conv_kernel,
        out_shape=jax.ShapeDtypeStruct((n * h, wcout), jnp.float32),
        in_specs=[vmem] * 9,
        out_specs=vmem,
        scratch_shapes=[pltpu.VMEM((n, h, k1pad), jnp.bfloat16),
                        pltpu.VMEM((n, h, k2pad), jnp.bfloat16)],
        compiler_params=pltpu.CompilerParams(vmem_limit_bytes=vmem_limit),
    )(x2d, prep['m1'], prep['m2'], prep['gath'], prep['scat'],
      prep['g1'], prep['be1'], prep['g2'], prep['be2'])

    return out2d.reshape(n, h, wd, cout)


def encoding_block(x_nchw, params):
    """PyTorch-parity entry point: NCHW in, NCHW out (transposes are wrapper glue only).
    For repeated calls, run prepare_block_params once and call double_conv_block_nhwc."""
    prep = prepare_block_params(params, x_nchw.shape[3])
    x_nhwc = jnp.transpose(x_nchw, (0, 2, 3, 1))
    out_nhwc = double_conv_block_nhwc(x_nhwc, prep)
    return jnp.transpose(out_nhwc, (0, 3, 1, 2))


def init_params(key, cin, cout, k=3):
    """Deterministic synthetic parameters matching the module's shapes (HWIO weights)."""
    ks = jax.random.split(key, 8)
    w1 = jax.random.normal(ks[0], (k, k, cin, cout), jnp.float32) * 0.2
    b1 = jax.random.normal(ks[1], (cout,), jnp.float32) * 0.1
    w2 = jax.random.normal(ks[2], (k, k, cout, cout), jnp.float32) * 0.2
    b2 = jax.random.normal(ks[3], (cout,), jnp.float32) * 0.1
    # BN affine perturbed from the PyTorch default (1, 0) so the affine path is exercised.
    g1 = 1.0 + 0.1 * jax.random.normal(ks[4], (cout,), jnp.float32)
    be1 = 0.1 * jax.random.normal(ks[5], (cout,), jnp.float32)
    g2 = 1.0 + 0.1 * jax.random.normal(ks[6], (cout,), jnp.float32)
    be2 = 0.1 * jax.random.normal(ks[7], (cout,), jnp.float32)
    return (w1, b1, g1, be1, w2, b2, g2, be2)


def reference_forward(x_nchw, params):
    """Pure-JAX reference (conv+bias, training-mode BN, ReLU; twice). NCHW in/out."""
    w1, b1, g1, be1, w2, b2, g2, be2 = params
    x = jnp.transpose(x_nchw, (0, 2, 3, 1)).astype(jnp.float32)

    def conv_bn_relu(inp, wgt, bias, gamma, beta):
        y = jax.lax.conv_general_dilated(
            inp, wgt, window_strides=(1, 1), padding=((1, 1), (1, 1)),
            dimension_numbers=('NHWC', 'HWIO', 'NHWC'),
            precision=jax.lax.Precision.HIGHEST) + bias
        mean = jnp.mean(y, axis=(0, 1, 2))
        var = jnp.mean((y - mean) ** 2, axis=(0, 1, 2))
        y = (y - mean) * jax.lax.rsqrt(var + EPS)
        return jnp.maximum(y * gamma + beta, 0.0)

    y = conv_bn_relu(x, w1, b1, g1, be1)
    y = conv_bn_relu(y, w2, b2, g2, be2)
    return jnp.transpose(y, (0, 3, 1, 2))


if __name__ == "__main__":
    N, CIN, COUT, H, W = 2, 4, 8, 16, 16       # W * COUT = 128 -> fully lane-dense output
    key = jax.random.PRNGKey(0)
    kx, kp = jax.random.split(key)

    x = jax.random.normal(kx, (N, CIN, H, W), jnp.float32)   # NCHW, like PyTorch
    params = init_params(kp, CIN, COUT)

    out = jax.block_until_ready(encoding_block(x, params))
    ref = jax.block_until_ready(reference_forward(x, params))

    assert out.shape == (N, COUT, H, W), out.shape
    # Tolerance covers bf16 MXU operands (vs a Precision.HIGHEST f32 reference), the exact
    # conv-bias fold, and the single-pass variance reformulation; BN keeps values O(1).
    np.testing.assert_allclose(np.asarray(out), np.asarray(ref), rtol=5e-2, atol=7.5e-2)
    print("KERNEL_OK")
</pallas_src>

<mosaic_0001>
module attributes {stable_mosaic.version = 11 : i64} {
  func.func @_double_conv_kernel(%arg0: memref<2x16x64xbf16, #tpu.memory_space<vmem>>, %arg1: memref<256x128xbf16, #tpu.memory_space<vmem>>, %arg2: memref<384x128xbf16, #tpu.memory_space<vmem>>, %arg3: memref<128x8xf32, #tpu.memory_space<vmem>>, %arg4: memref<8x128xf32, #tpu.memory_space<vmem>>, %arg5: memref<1x8xf32, #tpu.memory_space<vmem>>, %arg6: memref<1x8xf32, #tpu.memory_space<vmem>>, %arg7: memref<1x8xf32, #tpu.memory_space<vmem>>, %arg8: memref<1x8xf32, #tpu.memory_space<vmem>>, %arg9: memref<32x128xf32, #tpu.memory_space<vmem>>, %arg10: memref<2x16x256xbf16, #tpu.memory_space<vmem>>, %arg11: memref<2x16x384xbf16, #tpu.memory_space<vmem>>) attributes {dimension_semantics = [], scalar_prefetch = 0 : i64, scratch_operands = 2 : i64, tpu.core_type = #tpu.core_type<tc>} {
    %c0 = arith.constant 0 : index
    %c0_0 = arith.constant 0 : index
    %c0_1 = arith.constant 0 : index
    %0 = vector.load %arg0[%c0, %c0_0, %c0_1] : memref<2x16x64xbf16, #tpu.memory_space<vmem>>, vector<2x16x64xbf16>
    %1 = arith.extf %0 : vector<2x16x64xbf16> to vector<2x16x64xf32>
    %cst = arith.constant 0.000000e+00 : f32
    %2 = vector.broadcast %cst : f32 to vector<2x1x64xf32>
    %3 = vector.extract_strided_slice %1 {offsets = [0, 0, 0], sizes = [2, 15, 64], strides = [1, 1, 1]} : vector<2x16x64xf32> to vector<2x15x64xf32>
    %4 = tpu.concatenate %2, %3 in 1 : vector<2x1x64xf32>, vector<2x15x64xf32> -> vector<2x16x64xf32>
    %5 = vector.extract_strided_slice %1 {offsets = [0, 1, 0], sizes = [2, 15, 64], strides = [1, 1, 1]} : vector<2x16x64xf32> to vector<2x15x64xf32>
    %6 = tpu.concatenate %5, %2 in 1 : vector<2x15x64xf32>, vector<2x1x64xf32> -> vector<2x16x64xf32>
    %7 = arith.truncf %4 : vector<2x16x64xf32> to vector<2x16x64xbf16>
    %c0_2 = arith.constant 0 : index
    %c0_3 = arith.constant 0 : index
    %c0_4 = arith.constant 0 : index
    %8 = vector.load %arg10[%c0_2, %c0_3, %c0_4] : memref<2x16x256xbf16, #tpu.memory_space<vmem>>, vector<2x16x64xbf16>
    tpu.vector_store %arg10[%c0_2, %c0_3, %c0_4], %7 {strides = array<i32>} : memref<2x16x256xbf16, #tpu.memory_space<vmem>>, vector<2x16x64xbf16>,
    %9 = arith.truncf %1 : vector<2x16x64xf32> to vector<2x16x64xbf16>
    %c0_5 = arith.constant 0 : index
    %c0_6 = arith.constant 0 : index
    %c64 = arith.constant 64 : index
    %10 = vector.load %arg10[%c0_5, %c0_6, %c64] : memref<2x16x256xbf16, #tpu.memory_space<vmem>>, vector<2x16x64xbf16>
    tpu.vector_store %arg10[%c0_5, %c0_6, %c64], %9 {strides = array<i32>} : memref<2x16x256xbf16, #tpu.memory_space<vmem>>, vector<2x16x64xbf16>,
    %11 = arith.truncf %6 : vector<2x16x64xf32> to vector<2x16x64xbf16>
    %c0_7 = arith.constant 0 : index
    %c0_8 = arith.constant 0 : index
    %c128 = arith.constant 128 : index
    %12 = vector.load %arg10[%c0_7, %c0_8, %c128] : memref<2x16x256xbf16, #tpu.memory_space<vmem>>, vector<2x16x64xbf16>
    tpu.vector_store %arg10[%c0_7, %c0_8, %c128], %11 {strides = array<i32>} : memref<2x16x256xbf16, #tpu.memory_space<vmem>>, vector<2x16x64xbf16>,
    %cst_9 = arith.constant 0.000000e+00 : bf16
    %13 = vector.broadcast %cst_9 : bf16 to vector<2x16x64xbf16>
    %c0_10 = arith.constant 0 : index
    %c0_11 = arith.constant 0 : index
    %c192 = arith.constant 192 : index
    %14 = vector.load %arg10[%c0_10, %c0_11, %c192] : memref<2x16x256xbf16, #tpu.memory_space<vmem>>, vector<2x16x64xbf16>
    tpu.vector_store %arg10[%c0_10, %c0_11, %c192], %13 {strides = array<i32>} : memref<2x16x256xbf16, #tpu.memory_space<vmem>>, vector<2x16x64xbf16>,
    %c0_12 = arith.constant 0 : index
    %c0_13 = arith.constant 0 : index
    %c0_14 = arith.constant 0 : index
    %15 = vector.load %arg10[%c0_12, %c0_13, %c0_14] : memref<2x16x256xbf16, #tpu.memory_space<vmem>>, vector<2x16x256xbf16>
    %16 = vector.shape_cast %15 : vector<2x16x256xbf16> to vector<32x256xbf16>
    %c0_15 = arith.constant 0 : index
    %c0_16 = arith.constant 0 : index
    %17 = vector.load %arg1[%c0_15, %c0_16] : memref<256x128xbf16, #tpu.memory_space<vmem>>, vector<256x128xbf16>
    %cst_17 = arith.constant dense<0.000000e+00> : vector<32x128xf32>
    %18 = tpu.matmul %16, %17, %cst_17 {dimension_numbers = #tpu.dot_dimension_numbers<[1], [0], [0], [1], [0, 0, 1, 1], [], []>} : vector<32x256xbf16>, vector<256x128xbf16>, vector<32x128xf32> -> vector<32x128xf32>
    %cst_18 = arith.constant dense<0.000000e+00> : vector<128xf32>
    %19 = vector.multi_reduction <add>, %18, %cst_18 [0] : vector<32x128xf32> to vector<128xf32>
    %20 = vector.shape_cast %19 : vector<128xf32> to vector<1x128xf32>
    %21 = arith.mulf %18, %18 : vector<32x128xf32>
    %cst_19 = arith.constant dense<0.000000e+00> : vector<128xf32>
    %22 = vector.multi_reduction <add>, %21, %cst_19 [0] : vector<32x128xf32> to vector<128xf32>
    %23 = vector.shape_cast %22 : vector<128xf32> to vector<1x128xf32>
    %24 = tpu.concatenate %20, %23 in 0 : vector<1x128xf32>, vector<1x128xf32> -> vector<2x128xf32>
    %c0_20 = arith.constant 0 : index
    %c0_21 = arith.constant 0 : index
    %25 = vector.load %arg3[%c0_20, %c0_21] : memref<128x8xf32, #tpu.memory_space<vmem>>, vector<128x8xf32>
    %cst_22 = arith.constant dense<0.000000e+00> : vector<2x8xf32>
    %26 = tpu.matmul %24, %25, %cst_22 {dimension_numbers = #tpu.dot_dimension_numbers<[1], [0], [0], [1], [0, 0, 1, 1], [], []>} : vector<2x128xf32>, vector<128x8xf32>, vector<2x8xf32> -> vector<2x8xf32>
    %cst_23 = arith.constant 0.001953125 : f32
    %27 = vector.broadcast %cst_23 : f32 to vector<2x8xf32>
    %28 = arith.mulf %26, %27 : vector<2x8xf32>
    %29 = vector.extract_strided_slice %28 {offsets = [0, 0], sizes = [1, 8], strides = [1, 1]} : vector<2x8xf32> to vector<1x8xf32>
    %30 = vector.extract_strided_slice %28 {offsets = [1, 0], sizes = [1, 8], strides = [1, 1]} : vector<2x8xf32> to vector<1x8xf32>
    %31 = arith.mulf %29, %29 : vector<1x8xf32>
    %32 = arith.subf %30, %31 : vector<1x8xf32>
    %c0_24 = arith.constant 0 : index
    %c0_25 = arith.constant 0 : index
    %33 = vector.load %arg5[%c0_24, %c0_25] : memref<1x8xf32, #tpu.memory_space<vmem>>, vector<1x8xf32>
    %cst_26 = arith.constant 9.99999974E-6 : f32
    %34 = vector.broadcast %cst_26 : f32 to vector<1x8xf32>
    %35 = arith.addf %32, %34 : vector<1x8xf32>
    %36 = math.rsqrt %35 : vector<1x8xf32>
    %37 = arith.mulf %33, %36 : vector<1x8xf32>
    %c0_27 = arith.constant 0 : index
    %c0_28 = arith.constant 0 : index
    %38 = vector.load %arg6[%c0_27, %c0_28] : memref<1x8xf32, #tpu.memory_space<vmem>>, vector<1x8xf32>
    %39 = arith.mulf %29, %37 : vector<1x8xf32>
    %40 = arith.subf %38, %39 : vector<1x8xf32>
    %41 = tpu.concatenate %37, %40 in 0 : vector<1x8xf32>, vector<1x8xf32> -> vector<2x8xf32>
    %c0_29 = arith.constant 0 : index
    %c0_30 = arith.constant 0 : index
    %42 = vector.load %arg4[%c0_29, %c0_30] : memref<8x128xf32, #tpu.memory_space<vmem>>, vector<8x128xf32>
    %cst_31 = arith.constant dense<0.000000e+00> : vector<2x128xf32>
    %43 = tpu.matmul %41, %42, %cst_31 {dimension_numbers = #tpu.dot_dimension_numbers<[1], [0], [0], [1], [0, 0, 1, 1], [], []>} : vector<2x8xf32>, vector<8x128xf32>, vector<2x128xf32> -> vector<2x128xf32>
    %44 = vector.extract_strided_slice %43 {offsets = [0, 0], sizes = [1, 128], strides = [1, 1]} : vector<2x128xf32> to vector<1x128xf32>
    %45 = vector.broadcast %44 : vector<1x128xf32> to vector<32x128xf32>
    %46 = arith.mulf %18, %45 : vector<32x128xf32>
    %47 = vector.extract_strided_slice %43 {offsets = [1, 0], sizes = [1, 128], strides = [1, 1]} : vector<2x128xf32> to vector<1x128xf32>
    %48 = vector.broadcast %47 : vector<1x128xf32> to vector<32x128xf32>
    %49 = arith.addf %46, %48 : vector<32x128xf32>
    %cst_32 = arith.constant 0.000000e+00 : f32
    %50 = vector.broadcast %cst_32 : f32 to vector<32x128xf32>
    %51 = arith.maximumf %49, %50 : vector<32x128xf32>
    %52 = vector.shape_cast %51 : vector<32x128xf32> to vector<2x16x128xf32>
    %cst_33 = arith.constant 0.000000e+00 : f32
    %53 = vector.broadcast %cst_33 : f32 to vector<2x1x128xf32>
    %54 = vector.extract_strided_slice %52 {offsets = [0, 0, 0], sizes = [2, 15, 128], strides = [1, 1, 1]} : vector<2x16x128xf32> to vector<2x15x128xf32>
    %55 = tpu.concatenate %53, %54 in 1 : vector<2x1x128xf32>, vector<2x15x128xf32> -> vector<2x16x128xf32>
    %56 = vector.extract_strided_slice %52 {offsets = [0, 1, 0], sizes = [2, 15, 128], strides = [1, 1, 1]} : vector<2x16x128xf32> to vector<2x15x128xf32>
    %57 = tpu.concatenate %56, %53 in 1 : vector<2x15x128xf32>, vector<2x1x128xf32> -> vector<2x16x128xf32>
    %58 = arith.truncf %55 : vector<2x16x128xf32> to vector<2x16x128xbf16>
    %c0_34 = arith.constant 0 : index
    %c0_35 = arith.constant 0 : index
    %c0_36 = arith.constant 0 : index
    %59 = vector.load %arg11[%c0_34, %c0_35, %c0_36] : memref<2x16x384xbf16, #tpu.memory_space<vmem>>, vector<2x16x128xbf16>
    tpu.vector_store %arg11[%c0_34, %c0_35, %c0_36], %58 {strides = array<i32>} : memref<2x16x384xbf16, #tpu.memory_space<vmem>>, vector<2x16x128xbf16>,
    %60 = arith.truncf %52 : vector<2x16x128xf32> to vector<2x16x128xbf16>
    %c0_37 = arith.constant 0 : index
    %c0_38 = arith.constant 0 : index
    %c128_39 = arith.constant 128 : index
    %61 = vector.load %arg11[%c0_37, %c0_38, %c128_39] : memref<2x16x384xbf16, #tpu.memory_space<vmem>>, vector<2x16x128xbf16>
    tpu.vector_store %arg11[%c0_37, %c0_38, %c128_39], %60 {strides = array<i32>} : memref<2x16x384xbf16, #tpu.memory_space<vmem>>, vector<2x16x128xbf16>,
    %62 = arith.truncf %57 : vector<2x16x128xf32> to vector<2x16x128xbf16>
    %c0_40 = arith.constant 0 : index
    %c0_41 = arith.constant 0 : index
    %c256 = arith.constant 256 : index
    %63 = vector.load %arg11[%c0_40, %c0_41, %c256] : memref<2x16x384xbf16, #tpu.memory_space<vmem>>, vector<2x16x128xbf16>
    tpu.vector_store %arg11[%c0_40, %c0_41, %c256], %62 {strides = array<i32>} : memref<2x16x384xbf16, #tpu.memory_space<vmem>>, vector<2x16x128xbf16>,
    %c0_42 = arith.constant 0 : index
    %c0_43 = arith.constant 0 : index
    %c0_44 = arith.constant 0 : index
    %64 = vector.load %arg11[%c0_42, %c0_43, %c0_44] : memref<2x16x384xbf16, #tpu.memory_space<vmem>>, vector<2x16x384xbf16>
    %65 = vector.shape_cast %64 : vector<2x16x384xbf16> to vector<32x384xbf16>
    %c0_45 = arith.constant 0 : index
    %c0_46 = arith.constant 0 : index
    %66 = vector.load %arg2[%c0_45, %c0_46] : memref<384x128xbf16, #tpu.memory_space<vmem>>, vector<384x128xbf16>
    %cst_47 = arith.constant dense<0.000000e+00> : vector<32x128xf32>
    %67 = tpu.matmul %65, %66, %cst_47 {dimension_numbers = #tpu.dot_dimension_numbers<[1], [0], [0], [1], [0, 0, 1, 1], [], []>} : vector<32x384xbf16>, vector<384x128xbf16>, vector<32x128xf32> -> vector<32x128xf32>
    %cst_48 = arith.constant dense<0.000000e+00> : vector<128xf32>
    %68 = vector.multi_reduction <add>, %67, %cst_48 [0] : vector<32x128xf32> to vector<128xf32>
    %69 = vector.shape_cast %68 : vector<128xf32> to vector<1x128xf32>
    %70 = arith.mulf %67, %67 : vector<32x128xf32>
    %cst_49 = arith.constant dense<0.000000e+00> : vector<128xf32>
    %71 = vector.multi_reduction <add>, %70, %cst_49 [0] : vector<32x128xf32> to vector<128xf32>
    %72 = vector.shape_cast %71 : vector<128xf32> to vector<1x128xf32>
    %73 = tpu.concatenate %69, %72 in 0 : vector<1x128xf32>, vector<1x128xf32> -> vector<2x128xf32>
    %c0_50 = arith.constant 0 : index
    %c0_51 = arith.constant 0 : index
    %74 = vector.load %arg3[%c0_50, %c0_51] : memref<128x8xf32, #tpu.memory_space<vmem>>, vector<128x8xf32>
    %cst_52 = arith.constant dense<0.000000e+00> : vector<2x8xf32>
    %75 = tpu.matmul %73, %74, %cst_52 {dimension_numbers = #tpu.dot_dimension_numbers<[1], [0], [0], [1], [0, 0, 1, 1], [], []>} : vector<2x128xf32>, vector<128x8xf32>, vector<2x8xf32> -> vector<2x8xf32>
    %cst_53 = arith.constant 0.001953125 : f32
    %76 = vector.broadcast %cst_53 : f32 to vector<2x8xf32>
    %77 = arith.mulf %75, %76 : vector<2x8xf32>
    %78 = vector.extract_strided_slice %77 {offsets = [0, 0], sizes = [1, 8], strides = [1, 1]} : vector<2x8xf32> to vector<1x8xf32>
    %79 = vector.extract_strided_slice %77 {offsets = [1, 0], sizes = [1, 8], strides = [1, 1]} : vector<2x8xf32> to vector<1x8xf32>
    %80 = arith.mulf %78, %78 : vector<1x8xf32>
    %81 = arith.subf %79, %80 : vector<1x8xf32>
    %c0_54 = arith.constant 0 : index
    %c0_55 = arith.constant 0 : index
    %82 = vector.load %arg7[%c0_54, %c0_55] : memref<1x8xf32, #tpu.memory_space<vmem>>, vector<1x8xf32>
    %cst_56 = arith.constant 9.99999974E-6 : f32
    %83 = vector.broadcast %cst_56 : f32 to vector<1x8xf32>
    %84 = arith.addf %81, %83 : vector<1x8xf32>
    %85 = math.rsqrt %84 : vector<1x8xf32>
    %86 = arith.mulf %82, %85 : vector<1x8xf32>
    %c0_57 = arith.constant 0 : index
    %c0_58 = arith.constant 0 : index
    %87 = vector.load %arg8[%c0_57, %c0_58] : memref<1x8xf32, #tpu.memory_space<vmem>>, vector<1x8xf32>
    %88 = arith.mulf %78, %86 : vector<1x8xf32>
    %89 = arith.subf %87, %88 : vector<1x8xf32>
    %90 = tpu.concatenate %86, %89 in 0 : vector<1x8xf32>, vector<1x8xf32> -> vector<2x8xf32>
    %c0_59 = arith.constant 0 : index
    %c0_60 = arith.constant 0 : index
    %91 = vector.load %arg4[%c0_59, %c0_60] : memref<8x128xf32, #tpu.memory_space<vmem>>, vector<8x128xf32>
    %cst_61 = arith.constant dense<0.000000e+00> : vector<2x128xf32>
    %92 = tpu.matmul %90, %91, %cst_61 {dimension_numbers = #tpu.dot_dimension_numbers<[1], [0], [0], [1], [0, 0, 1, 1], [], []>} : vector<2x8xf32>, vector<8x128xf32>, vector<2x128xf32> -> vector<2x128xf32>
    %93 = vector.extract_strided_slice %92 {offsets = [0, 0], sizes = [1, 128], strides = [1, 1]} : vector<2x128xf32> to vector<1x128xf32>
    %94 = vector.broadcast %93 : vector<1x128xf32> to vector<32x128xf32>
    %95 = arith.mulf %67, %94 : vector<32x128xf32>
    %96 = vector.extract_strided_slice %92 {offsets = [1, 0], sizes = [1, 128], strides = [1, 1]} : vector<2x128xf32> to vector<1x128xf32>
    %97 = vector.broadcast %96 : vector<1x128xf32> to vector<32x128xf32>
    %98 = arith.addf %95, %97 : vector<32x128xf32>
    %cst_62 = arith.constant 0.000000e+00 : f32
    %99 = vector.broadcast %cst_62 : f32 to vector<32x128xf32>
    %100 = arith.maximumf %98, %99 : vector<32x128xf32>
    %c0_63 = arith.constant 0 : index
    %c0_64 = arith.constant 0 : index
    %101 = vector.load %arg9[%c0_63, %c0_64] : memref<32x128xf32, #tpu.memory_space<vmem>>, vector<32x128xf32>
    tpu.vector_store %arg9[%c0_63, %c0_64], %100 {strides = array<i32>} : memref<32x128xf32, #tpu.memory_space<vmem>>, vector<32x128xf32>,
    return
  }
}

</mosaic_0001>

<bundles_post_ra>
// kernel: tpu_custom_call.1
= control target key start
LH: loop header
LB: loop body
LE: loop exit
PB: predicated region body
PF: predicated region fallthrough
CT: control target
= control target key end

     0   :  { %14 = vsyncpa [#allocation5], 0  ;;  %s1952_s0 = inlined_call_operand.hbm [shape: bf16[2,16,64], index: 0, kind: input, shape index: {}]   ;;  %s1953_s1 = inlined_call_operand.vmem [shape: bf16[256,128], index: 1, kind: input, shape index: {}]   ;;  %s1954_s2 = inlined_call_operand.hbm [shape: bf16[384,128], index: 2, kind: input, shape index: {}]   ;;  %s1955_s3 = inlined_call_operand.vmem [shape: f32[128,8], index: 3, kind: input, shape index: {}]   ;;  %s1956_s4 = inlined_call_operand.vmem [shape: f32[8,128], index: 4, kind: input, shape index: {}]   ;;  %s1957_s5 = inlined_call_operand.vmem [shape: f32[1,8], index: 5, kind: input, shape index: {}]   ;;  %s1958_s6 = inlined_call_operand.vmem [shape: f32[1,8], index: 6, kind: input, shape index: {}]   ;;  %s1959_s7 = inlined_call_operand.vmem [shape: f32[1,8], index: 7, kind: input, shape index: {}]   ;;  %s1960_s8 = inlined_call_operand.vmem [shape: f32[1,8], index: 8, kind: input, shape index: {}]   ;;  %s1961_s9 = inlined_call_operand.hbm [shape: f32[32,128], index: 9, kind: output, shape index: {}]  }
   0x1   :  { %15 = vsyncpa [#allocation8], 0 }
   0x2   :  { %16 = vsyncpa [#allocation6], 0  ;;  %s1593_s30 = smov [#allocation4]   ;;  %s1521_s13 = scalar_lea.hbm %s1952_s0, 256 }
   0x3   :  { %s22_s10 = sshll.u32 %s1593_s30, 4  ;;  %p1522_p0 = scmp.ne.s32.totalorder %s1952_s0, %s1521_s13  ;;  %s23_s10 = int_to_ptr.vmem [resolvable:$true] %s22_s10 }
   0x4   :  { %p1525_p1 = scmp.lt.u32.totalorder %s1521_s13, %s1952_s0 }
   0x6   :  { %p1527_p2 = pnand %p1525_p1, %p1522_p0 }
   0x8   :  { %1530 = shalt.err (!%p1527_p2)
}
   0x9   :  { %s1531_s18 = scalar_lea.vmem %s23_s10, 256  ;;  %p1536_p4 = scmp.lt.s32.totalorder %s23_s10, %s23_s10 }
   0xa   :  { %p1532_p3 = scmp.ne.s32.totalorder %s23_s10, %s1531_s18  ;;  %p1537_p5 = scmp.lt.s32.totalorder %s1531_s18, %s1531_s18 }
   0xc   :  { %p1538_p6 = por %p1537_p5, %p1536_p4 }
   0xe   :  { %p1539_p7 = pnand %p1538_p6, %p1532_p3 }
  0x10   :  { %1542 = shalt.err (!%p1539_p7)
}
  0x11   :  { %s1594_s19 = smov 64   ;;  %s1595_s20 = smov 4  }
  0x12   :  { %28 = dma.hbm_to_vmem [thread:$0]  %s1952_s0, 256, %s23_s10, [#allocation5], %s1594_s19, %s1594_s19, %s1595_s20  }
  0x13   :  { %s1596_s23 = smov [#allocation7]   ;;  %s1543_s27 = scalar_lea.hbm %s1954_s2, 3072 }
  0x14   :  { %s36_s24 = sshll.u32 %s1596_s23, 4  ;;  %p1544_p8 = scmp.ne.s32.totalorder %s1954_s2, %s1543_s27  ;;  %s37_s24 = int_to_ptr.vmem [resolvable:$true] %s36_s24 }
  0x15   :  { %p1547_p9 = scmp.lt.u32.totalorder %s1543_s27, %s1954_s2 }
  0x17   :  { %p1549_p10 = pnand %p1547_p9, %p1544_p8 }
  0x19   :  { %1552 = shalt.err (!%p1549_p10)
}
  0x1a   :  { %s1553_s12 = scalar_lea.vmem %s37_s24, 3072  ;;  %p1558_p12 = scmp.lt.s32.totalorder %s37_s24, %s37_s24 }
  0x1b   :  { %p1554_p11 = scmp.ne.s32.totalorder %s37_s24, %s1553_s12  ;;  %p1559_p13 = scmp.lt.s32.totalorder %s1553_s12, %s1553_s12 }
  0x1d   :  { %p1560_p0 = por %p1559_p13, %p1558_p12 }
  0x1f   :  { %p1561_p1 = pnand %p1560_p0, %p1554_p11 }
  0x21   :  { %1564 = shalt.err (!%p1561_p1)
}
  0x22   :  { %42 = dma.hbm_to_vmem [thread:$0]  %s1954_s2, 3072, %s37_s24, [#allocation8], %s1594_s19, %s1594_s19, %s1595_s20  }
  0x23   :  { %1587 = dma.done.wait [#allocation5], 256  }
  0x24   :  { %1588 = vsyncadd [#allocation5], 4294967040 }
  0x25   :  { %1589 = dma.done.wait [#allocation8], 3072  }
  0x26   :  { %1590 = vsyncadd [#allocation8], 4294964224  ;;  %vm74_vm0 = vcmask 1040384   ;;  %vm87_vm1 = vcmask 1046528   ;;  %v62_v0 = vld [vmem:[#allocation4] sm:$0xff]   ;;  %vm102_vm2 = vcmask 523264  }
  0x27   :  { %v64_v1 = vld [vmem:[#allocation4 + $0x8] sm:$0xff]   ;;  %vm121_vm3 = vcmask 1048064   ;;  %v67_v2 = vunpack.c.h.bf16 %v62_v0  ;;  %v66_v3 = vunpack.c.l.bf16 %v62_v0  ;;  %v1475_v5 = vld [vmem:[%s1953_s1 + $0x40] sm:$0xff]   ;;  %115 = vrot.lane.b32.xlu0 %v62_v0, %s1594_s19  ;;  %v1479_v26 = vld [vmem:[%s1953_s1 + $0x50] sm:$0xff]   ;;  %v1597_v33 = vmov 0  }
  0x28   :  { %v68_v4 = vunpack.c.l.bf16 %v64_v1  ;;  %v69_v6 = vunpack.c.h.bf16 %v64_v1  ;;  %v1476_v7 = vld [vmem:[%s1953_s1] sm:$0xff]   ;;  %1208 = vmatprep.subr.bf16.mxu0 %v1475_v5  ;;  %v1477_v16 = vld [vmem:[%s1953_s1 + $0x48] sm:$0xff]   ;;  %v1480_v31 = vld [vmem:[%s1953_s1 + $0x10] sm:$0xff]   ;;  %v1598_v34 = vmov 0.0|0.0   ;;  %vm1599_vm4 = vmmov 0  }
  0x29   :  { %v76_v8 = vrot.slane %v67_v2, 7  ;;  %v89_v9 = vrot.slane %v67_v2, 1  ;;  %v75_v10 = vrot.slane %v66_v3, 7  ;;  %v88_v11 = vrot.slane %v66_v3, 1  ;;  %1209 = vmatpush3.bf16.msra.mxu0 %v1476_v7  ;;  %v1478_v17 = vld [vmem:[%s1953_s1 + $0x8] sm:$0xff]   ;;  %v1481_v32 = vld [vmem:[%s1953_s1 + $0x58] sm:$0xff]   ;;  %1412 = vmatprep.subr.bf16.mxu1 %v1598_v34  ;;  %vm1194_vm6 = vmneg %vm74_vm0 }
  0x2a   :  { %v78_v12 = vrot.slane %v68_v4, 7  ;;  %v79_v13 = vrot.slane %v69_v6, 7  ;;  %v91_v14 = vrot.slane %v68_v4, 1  ;;  %v92_v15 = vrot.slane %v69_v6, 1  ;;  %1210 = vmatprep.subr.bf16.mxu0 %v1477_v16  ;;  %v1482_v35 = vld [vmem:[%s1953_s1 + $0x18] sm:$0xff]   ;;  %v1483_v36 = vld [vmem:[%s1953_s1 + $0x60] sm:$0xff]  }
  0x2b   :  { %v98_v18 = vsel %vm87_vm1, %v89_v9, 0.0  ;;  %v77_v19 = vsel %vm74_vm0, %v75_v10, %v76_v8  ;;  %v85_v20 = vsel %vm74_vm0, 0.0, %v75_v10  ;;  %v90_v21 = vsel %vm87_vm1, %v88_v11, %v89_v9  ;;  %117 = vrot.lane.b32.xlu0 %v64_v1, %s1594_s19  ;;  %v1484_v37 = vld [vmem:[%s1953_s1 + $0x20] sm:$0xff]   ;;  %v1485_v38 = vld [vmem:[%s1953_s1 + $0x68] sm:$0xff]   ;;  %v1487_v41 = vld [vmem:[%s1953_s1 + $0x70] sm:$0xff]  }
  0x2c   :  { %v100_v22 = vpack.c.bf16 %v77_v19, %v85_v20  ;;  %v124_v23 = vpack.c.bf16 %v98_v18, %v90_v21  ;;  %v80_v24 = vsel %vm74_vm0, %v78_v12, %v79_v13  ;;  %v86_v25 = vsel %vm74_vm0, 0.0, %v78_v12  ;;  %v1486_v39 = vld [vmem:[%s1953_s1 + $0x28] sm:$0xff]   ;;  %v1488_v42 = vld [vmem:[%s1953_s1 + $0x30] sm:$0xff]   ;;  %v1489_v43 = vld [vmem:[%s1953_s1 + $0x78] sm:$0xff]  }
  0x2d   :  { %v93_v27 = vsel %vm87_vm1, %v91_v14, %v92_v15  ;;  %v99_v28 = vsel %vm87_vm1, %v92_v15, 0.0  ;;  %v101_v29 = vpack.c.bf16 %v80_v24, %v86_v25  ;;  %1211 = vmatpush3.bf16.msra.mxu0 %v1478_v17  ;;  %v1490_v44 = vld [vmem:[%s1953_s1 + $0x38] sm:$0xff]   ;;  %v334_v50 = vld [vmem:[%s1955_s3] sm:$0xff]  ;;  %v335_v51 = vld [vmem:[%s1955_s3 + $0x8] sm:$0xff]  ;;  %v1600_v9 = vmov 0.0  }
  0x2e   :  { %126 = vst.msk [vmem:[#allocation2 + $0x8] sm:$0xff] %vm102_vm2, %v124_v23  ;;  %103 = vst.msk [vmem:[#allocation2] sm:$0xff] %vm102_vm2, %v100_v22  ;;  %v125_v30 = vpack.c.bf16 %v99_v28, %v93_v27  ;;  %1212 = vmatprep.subr.bf16.mxu0 %v1479_v26  ;;  %v1757_v52 = vpack.c.bf16 %v335_v51, %v334_v50  ;;  %v336_v53 = vld [vmem:[%s1955_s3 + $0x10] sm:$0xff]  ;;  %v337_v54 = vld [vmem:[%s1955_s3 + $0x18] sm:$0xff]  ;;  %1344 = vmatprep.mubr.msk.f32.mxu1 %vm1599_vm4, %v1600_v9  ;;  %vm458_vm5 = vcmask 64512   ;;  %vm1602_vm7 = vmmov 1  }
  0x2f   :  { %104 = vst.msk [vmem:[#allocation2 + $0x10] sm:$0xff] %vm102_vm2, %v101_v29  ;;  %v1767_v55 = vpack.c.bf16 %v337_v54, %v336_v53  ;;  %v338_v56 = vld [vmem:[%s1955_s3 + $0x20] sm:$0xff]  ;;  %v339_v57 = vld [vmem:[%s1955_s3 + $0x28] sm:$0xff]  ;;  %v340_v59 = vld [vmem:[%s1955_s3 + $0x30] sm:$0xff] }
  0x30   :  { %128 = vst.msk [vmem:[#allocation2 + $0x8] sm:$0xff] %vm121_vm3, %v1597_v33  ;;  %1414 = vmatpush3.bf16.msra.mxu1 %v1757_v52  ;;  %v1777_v58 = vpack.c.bf16 %v339_v57, %v338_v56  ;;  %v341_v60 = vld [vmem:[%s1955_s3 + $0x38] sm:$0xff]  ;;  %v342_v62 = vld [vmem:[%s1955_s3 + $0x40] sm:$0xff]  ;;  %v343_v63 = vld [vmem:[%s1955_s3 + $0x48] sm:$0xff] }
  0x31   :  { %127 = vst.msk [vmem:[#allocation2 + $0x18] sm:$0xff] %vm102_vm2, %v125_v30  ;;  %1213 = vmatpush3.bf16.msra.mxu0 %v1480_v31  ;;  %1415 = vmatprep.subr.bf16.mxu1 %v1598_v34  ;;  %v1787_v61 = vpack.c.bf16 %v341_v60, %v340_v59  ;;  %v1797_v0 = vpack.c.bf16 %v343_v63, %v342_v62  ;;  %v344_v1 = vld [vmem:[%s1955_s3 + $0x50] sm:$0xff]  ;;  %v345_v2 = vld [vmem:[%s1955_s3 + $0x58] sm:$0xff]  ;;  %v346_v4 = vld [vmem:[%s1955_s3 + $0x60] sm:$0xff] }
  0x32   :  { %129 = vst.msk [vmem:[#allocation2 + $0x18] sm:$0xff] %vm121_vm3, %v1597_v33  ;;  %1214 = vmatprep.subr.bf16.mxu0 %v1481_v32  ;;  %v1807_v3 = vpack.c.bf16 %v345_v2, %v344_v1  ;;  %v347_v5 = vld [vmem:[%s1955_s3 + $0x68] sm:$0xff]  ;;  %v348_v7 = vld [vmem:[%s1955_s3 + $0x70] sm:$0xff]  ;;  %v349_v8 = vld [vmem:[%s1955_s3 + $0x78] sm:$0xff] }
  0x33   :  { %v1817_v6 = vpack.c.bf16 %v347_v5, %v346_v4  ;;  %v1828_v10 = vpack.c.bf16 %v349_v8, %v348_v7  ;;  %v1493_v50 = vld [vmem:[#allocation7 + $0x80] sm:$0xff]   ;;  %v1494_v51 = vld [vmem:[#allocation7 + $0x48] sm:$0xff]   ;;  %v1497_v54 = vld [vmem:[#allocation7 + $0x50] sm:$0xff]  }
  0x34   :  { %1417 = vmatpush3.bf16.msra.mxu1 %v1767_v55  ;;  %v1495_v53 = vld [vmem:[#allocation7 + $0x8] sm:$0xff]   ;;  %v1498_v56 = vld [vmem:[#allocation7 + $0x10] sm:$0xff]   ;;  %v1500_v57 = vld [vmem:[#allocation7 + $0x58] sm:$0xff]  }
  0x35   :  { %1215 = vmatpush3.bf16.msra.mxu0 %v1482_v35  ;;  %1418 = vmatprep.subr.bf16.mxu1 %v1598_v34  ;;  %v1501_v59 = vld [vmem:[#allocation7 + $0x18] sm:$0xff]   ;;  %v1503_v60 = vld [vmem:[#allocation7 + $0x60] sm:$0xff]   ;;  %vm1893_vm8 = vmpackc.low %vm1602_vm7, %vm1194_vm6 }
  0x36   :  { %1216 = vmatprep.subr.bf16.mxu0 %v1483_v36  ;;  %v1504_v62 = vld [vmem:[#allocation7 + $0x20] sm:$0xff]   ;;  %vm1202_vm9 = vmpackc.low %vm87_vm1, %vm1602_vm7 }
  0x37   :  { %v131_v40 = vld [vmem:[#allocation2 + $0x8] sm:$0xff] }
  0x38   :  { %294 = vmatprep.mubr.bf16.mxu0 %v131_v40  ;;  %1420 = vmatpush3.bf16.msra.mxu1 %v1777_v58 }
  0x39   :  { %1217 = vmatpush3.bf16.msra.mxu0 %v1484_v37  ;;  %v133_v47 = vld [vmem:[#allocation2 + $0x18] sm:$0xff]  ;;  %1421 = vmatprep.subr.bf16.mxu1 %v1598_v34 }
  0x3a   :  { %1218 = vmatprep.subr.bf16.mxu0 %v1485_v38 }
  0x3c   :  { %1423 = vmatpush3.bf16.msra.mxu1 %v1787_v61 }
  0x3d   :  { %1219 = vmatpush3.bf16.msra.mxu0 %v1486_v39  ;;  %1424 = vmatprep.subr.bf16.mxu1 %v1598_v34 }
  0x3e   :  { %1220 = vmatprep.subr.bf16.mxu0 %v1487_v41 }
  0x40   :  { %1426 = vmatpush3.bf16.msra.mxu1 %v1797_v0 }
  0x41   :  { %1221 = vmatpush3.bf16.msra.mxu0 %v1488_v42  ;;  %1427 = vmatprep.subr.bf16.mxu1 %v1598_v34 }
  0x42   :  { %1222 = vmatprep.subr.bf16.mxu0 %v1489_v43 }
  0x44   :  { %1429 = vmatpush3.bf16.msra.mxu1 %v1807_v3 }
  0x45   :  { %1223 = vmatpush3.bf16.msra.mxu0 %v1490_v44  ;;  %1430 = vmatprep.subr.bf16.mxu1 %v1598_v34 }
  0x48   :  { %1432 = vmatpush3.bf16.msra.mxu1 %v1817_v6 }
  0x49   :  { %1433 = vmatprep.subr.bf16.mxu1 %v1598_v34 }
  0x4c   :  { %1435 = vmatpush3.bf16.msra.mxu1 %v1828_v10 }
  0x4d   :  { %1347 = vmatprep.subr.mxu1 %v1600_v9 }
  0x99   :  { %v116_v45 = vpop.permute.xlu0 %115 }
  0x9a   :  { %122 = vst.msk [vmem:[#allocation2] sm:$0xff] %vm121_vm3, %v116_v45 }
  0x9d   :  { %v118_v46 = vpop.permute.xlu0 %117 }
  0x9e   :  { %123 = vst.msk [vmem:[#allocation2 + $0x10] sm:$0xff] %vm121_vm3, %v118_v46 }
  0xa1   :  { %v130_v48 = vld [vmem:[#allocation2] sm:$0xff] }
  0xa2   :  { %295 = vmatmul.mubr.bf16.vlgmr.msra.gmra.mrb[0].mxu0 %v130_v48  ;;  %v1491_v48 = vld [vmem:[#allocation7 + $0x40] sm:$0xff]  }
  0xa3   :  { %302 = vmatprep.mubr.bf16.mxu0 %v133_v47  ;;  %v1859_v47 = vld [vmem:[%s1956_s4] sm:$0xff]  ;;  %1255 = vmatprep.subr.bf16.mxu0 %v1491_v48 }
  0xa5   :  { %v132_v49 = vld [vmem:[#allocation2 + $0x10] sm:$0xff] }
  0xaa   :  { %303 = vmatmul.mubr.bf16.gmra.mrb[4].mxu0 %v132_v49  ;;  %v1492_v49 = vld [vmem:[#allocation7] sm:$0xff]  }
  0xab   :  { %1256 = vmatpush3.bf16.msra.mxu0 %v1492_v49 }
  0xac   :  { %1257 = vmatprep.subr.bf16.mxu0 %v1494_v51 }
  0xaf   :  { %1258 = vmatpush3.bf16.msra.mxu0 %v1495_v53 }
  0xb0   :  { %1259 = vmatprep.subr.bf16.mxu0 %v1497_v54 }
  0xb3   :  { %1260 = vmatpush3.bf16.msra.mxu0 %v1498_v56 }
  0xb4   :  { %1261 = vmatprep.subr.bf16.mxu0 %v1500_v57 }
  0xb7   :  { %1262 = vmatpush3.bf16.msra.mxu0 %v1501_v59 }
  0xb8   :  { %1263 = vmatprep.subr.bf16.mxu0 %v1503_v60 }
  0xbb   :  { %1264 = vmatpush3.bf16.msra.mxu0 %v1504_v62 }
 0x175   :  { %v1224_v11 = vpop.f32.mrb[0].mxu0 }
 0x176   :  { %v1225_v12 = vpop.f32.mrb[1].mxu0 }
 0x177   :  { %v1833_v13 = vadd.f32 %v1225_v12, %v1224_v11  ;;  %v1227_v14 = vpop.f32.mrb[2].mxu0  ;;  %v1601_v11 = vmov 1966171168  }
 0x178   :  { %v1228_v15 = vpop.f32.mrb[3].mxu0  ;;  %v431_v12 = vunpack.c.l.s4 %v1601_v11 }
 0x179   :  { %v1835_v16 = vadd.f32 %v1228_v15, %v1227_v14  ;;  %v320_v20 = vmul.f32 %v1833_v13, %v1833_v13  ;;  %v433_v14 = vlaneseq }
 0x17a   :  { %v432_v15 = vunpack.c.0.s8 %v431_v12 }
 0x17b   :  { %v321_v17 = vmul.f32 %v1835_v16, %v1835_v16  ;;  %v311_v21 = vadd.f32 %v1835_v16, %v1833_v13 }
 0x17d   :  { %v1230_v18 = vpop.f32.mrb[4].mxu0  ;;  %v324_v25 = vadd.f32 %v321_v17, %v320_v20  ;;  %v1862_v17 = vshrl.u32 %v433_v14, 7 }
 0x17e   :  { %v1231_v19 = vpop.f32.mrb[5].mxu0 }
 0x17f   :  { %v1843_v22 = vadd.f32 %v1231_v19, %v1230_v18  ;;  %v1233_v23 = vpop.f32.mrb[6].mxu0  ;;  %v1865_v18 = vsub.s32 %v432_v15, %v1862_v17  ;;  %v542_v48 = vsub.s32 1, %v1862_v17 }
 0x180   :  { %v1234_v24 = vpop.f32.mrb[7].mxu0 }
 0x181   :  { %v312_v26 = vadd.f32 %v1843_v22, %v311_v21  ;;  %v322_v27 = vmul.f32 %v1843_v22, %v1843_v22  ;;  %v1848_v28 = vadd.f32 %v1234_v24, %v1233_v23  ;;  %v426_v23 = vld [vmem:[%s1957_s5] sm:$0x1] }
 0x183   :  { %v325_v29 = vadd.f32 %v324_v25, %v322_v27  ;;  %v313_v30 = vadd.f32 %v1848_v28, %v312_v26  ;;  %v323_v31 = vmul.f32 %v1848_v28, %v1848_v28  ;;  %v447_v26 = vld [vmem:[%s1958_s6] sm:$0x1] }
 0x185   :  { %v314_v32 = vrot.slane %v313_v30, 4  ;;  %v326_v33 = vadd.f32 %v325_v29, %v323_v31  ;;  %v1876_v29 = vsub.s32 0, %v1862_v17 }
 0x187   :  { %v315_v35 = vadd.f32 %v314_v32, %v313_v30  ;;  %v327_v36 = vrot.slane %v326_v33, 4  ;;  %v1496_v32 = vld [vmem:[#allocation7 + $0x88] sm:$0xff]  }
 0x189   :  { %v316_v37 = vrot.slane %v315_v35, 2  ;;  %v328_v38 = vadd.f32 %v327_v36, %v326_v33  ;;  %v1502_v36 = vld [vmem:[#allocation7 + $0x98] sm:$0xff]  }
 0x18b   :  { %v317_v39 = vadd.f32 %v316_v37, %v315_v35  ;;  %v329_v40 = vrot.slane %v328_v38, 2  ;;  %v1499_v35 = vld [vmem:[#allocation7 + $0x90] sm:$0xff]   ;;  %v1505_v37 = vld [vmem:[#allocation7 + $0xa0] sm:$0xff]  }
 0x18d   :  { %v318_v41 = vrot.slane %v317_v39, 1  ;;  %v330_v42 = vadd.f32 %v329_v40, %v328_v38  ;;  %v1506_v38 = vld [vmem:[#allocation7 + $0x68] sm:$0xff]  }
 0x18e   :  { %v1508_v40 = vld [vmem:[#allocation7 + $0xa8] sm:$0xff]   ;;  %1265 = vmatprep.subr.bf16.mxu0 %v1506_v38 }
 0x18f   :  { %v331_v43 = vrot.slane %v330_v42, 1  ;;  %v319_v44 = vadd.f32 %v318_v41, %v317_v39  ;;  %v1507_v39 = vld [vmem:[#allocation7 + $0x28] sm:$0xff]   ;;  %v1509_v41 = vld [vmem:[#allocation7 + $0x70] sm:$0xff]  }
 0x190   :  { %1266 = vmatpush3.bf16.msra.mxu0 %v1507_v39 }
 0x191   :  { %v332_v45 = vadd.f32 %v331_v43, %v330_v42  ;;  %v1510_v42 = vld [vmem:[#allocation7 + $0x30] sm:$0xff]   ;;  %1267 = vmatprep.subr.bf16.mxu0 %v1509_v41 }
 0x192   :  { %v1511_v43 = vld [vmem:[#allocation7 + $0xb0] sm:$0xff]  }
 0x193   :  { %v333_v46 = vsel %vm74_vm0, %v319_v44, %v332_v45  ;;  %v1512_v44 = vld [vmem:[#allocation7 + $0x78] sm:$0xff]  }
 0x194   :  { %1345 = vmatmul.mubr.f32.vlgmr.msra.gmra.mrb[0].mxu1 %v333_v46  ;;  %1268 = vmatpush3.bf16.msra.mxu0 %v1510_v42  ;;  %v1513_v45 = vld [vmem:[#allocation7 + $0x38] sm:$0xff]  }
 0x195   :  { %1349 = vmatprep.mubr.msk.f32.mxu1 %vm1599_vm4, %v1600_v9  ;;  %1348 = vmatpush3.msra.mxu1 %v1859_v47  ;;  %v1514_v46 = vld [vmem:[#allocation7 + $0xb8] sm:$0xff]  }
 0x196   :  { %1352 = vmatprep.subr.bf16.mxu1 %v1493_v50  ;;  %1269 = vmatprep.subr.bf16.mxu0 %v1512_v44 }
 0x198   :  { %1270 = vmatpush3.bf16.msra.mxu0 %v1513_v45 }
 0x199   :  { %1436 = vmatprep.subr.bf16.mxu0 %v1598_v34 }
 0x267   :  { %v416_v63 = vpop.f32.mrb[0].mxu1 }
 0x268   :  { %v420_v1 = vmul.f32 0.001953125, %v416_v63  ;;  %v1346_v2 = vpop.f32.mrb[1].mxu1 }
 0x26a   :  { %v421_v4 = vmul.f32 %v420_v1, %v420_v1 }
 0x26c   :  { %v423_v5 = vrot.slane %v421_v4, 7 }
 0x26e   :  { %v425_v7 = vsub.f32 %v420_v1, %v423_v5 }
 0x270   :  { %v427_v8 = vadd.f32 1e-05, %v425_v7 }
 0x272   :  { %1517 = vrsqrt.f32 %v427_v8 }
 0x27c   :  { %v1518_v19 = vpop.eup %1517 }
 0x27d   :  { %v436_v20 = vrot.slane %v1518_v19, %v1865_v18 }
 0x27f   :  { %v437_v21 = vcombine.high %v436_v20, %v436_v20 }
 0x281   :  { %v444_v24 = vrot.slane %v437_v21, %v1865_v18 }
 0x283   :  { %v446_v25 = vmul.f32 %v444_v24, %v426_v23 }
 0x285   :  { %v448_v27 = vmul.f32 %v446_v25, %v420_v1 }
 0x287   :  { %v449_v30 = vsub.f32 %v447_v26, %v448_v27 }
 0x289   :  { %v454_v31 = vrot.slane %v449_v30, %v1876_v29 }
 0x28b   :  { %v456_v33 = vsel %vm74_vm0, %v446_v25, %v454_v31 }
 0x28c   :  { %1350 = vmatmul.mubr.msk.f32.vlgmr.msra.gmra.mrb[2].mxu1 %vm458_vm5, %v456_v33 }
 0x28d   :  { %1353 = vmatpush3.bf16.msra.mxu1 %v1493_v50 }
 0x28e   :  { %1354 = vmatprep.subr.bf16.mxu1 %v1496_v32 }
 0x291   :  { %1355 = vmatpush3.bf16.msra.mxu1 %v1496_v32 }
 0x292   :  { %1356 = vmatprep.subr.bf16.mxu1 %v1499_v35 }
 0x295   :  { %1357 = vmatpush3.bf16.msra.mxu1 %v1499_v35 }
 0x296   :  { %1358 = vmatprep.subr.bf16.mxu1 %v1502_v36 }
 0x299   :  { %1359 = vmatpush3.bf16.msra.mxu1 %v1502_v36 }
 0x29a   :  { %1360 = vmatprep.subr.bf16.mxu1 %v1505_v37 }
 0x29d   :  { %1361 = vmatpush3.bf16.msra.mxu1 %v1505_v37 }
 0x29e   :  { %1362 = vmatprep.subr.bf16.mxu1 %v1508_v40 }
 0x2a1   :  { %1363 = vmatpush3.bf16.msra.mxu1 %v1508_v40 }
 0x2a2   :  { %1364 = vmatprep.subr.bf16.mxu1 %v1511_v43 }
 0x2a5   :  { %1365 = vmatpush3.bf16.msra.mxu1 %v1511_v43 }
 0x2a6   :  { %1366 = vmatprep.subr.bf16.mxu1 %v1514_v46 }
 0x2a9   :  { %1367 = vmatpush3.bf16.msra.mxu1 %v1514_v46 }
 0x2aa   :  { %1407 = vmatprep.subr.mxu1 %v1600_v9 }
 0x35f   :  { %v528_v49 = vpop.f32.mrb[2].mxu1 }
 0x360   :  { %v535_v50 = vrot.slane %v528_v49, %v1876_v29  ;;  %v1351_v51 = vpop.f32.mrb[3].mxu1  ;;  %v543_v53 = vrot.slane %v528_v49, %v542_v48 }
 0x362   :  { %v536_v54 = vmul.f32 %v1833_v13, %v535_v50  ;;  %v537_v56 = vmul.f32 %v1835_v16, %v535_v50  ;;  %v538_v57 = vmul.f32 %v1843_v22, %v535_v50  ;;  %v539_v59 = vmul.f32 %v1848_v28, %v535_v50 }
 0x364   :  { %v544_v60 = vadd.f32 %v543_v53, %v536_v54  ;;  %v545_v62 = vadd.f32 %v543_v53, %v537_v56  ;;  %v546_v63 = vadd.f32 %v543_v53, %v538_v57  ;;  %v547_v1 = vadd.f32 %v543_v53, %v539_v59 }
 0x366   :  { %v548_v2 = vmax.f32 %v544_v60, 0.0  ;;  %v549_v4 = vmax.f32 %v545_v62, 0.0  ;;  %v550_v5 = vmax.f32 %v546_v63, 0.0  ;;  %v551_v7 = vmax.f32 %v547_v1, 0.0 }
 0x368   :  { %v556_v8 = vrot.slane %v548_v2, 7  ;;  %v557_v11 = vrot.slane %v549_v4, 7  ;;  %v584_v12 = vpack.c.bf16 %v549_v4, %v548_v2  ;;  %v568_v13 = vrot.slane %v548_v2, 1 }
 0x369   :  { %v569_v14 = vrot.slane %v549_v4, 1  ;;  %v571_v16 = vrot.slane %v550_v5, 1  ;;  %v572_v15 = vrot.slane %v551_v7, 1  ;;  %v585_v21 = vpack.c.bf16 %v551_v7, %v550_v5 }
 0x36a   :  { %v558_v22 = vsel %vm74_vm0, %v556_v8, %v557_v11  ;;  %822 = vmatprep.mubr.bf16.mxu0 %v584_v12  ;;  %v559_v26 = vrot.slane %v550_v5, 7  ;;  %v560_v27 = vrot.slane %v551_v7, 7 }
 0x36b   :  { %v1196_v19 = vpack.c.bf16 %v558_v22, %v556_v8  ;;  %v570_v20 = vsel %vm87_vm1, %v568_v13, %v569_v14  ;;  %v573_v23 = vsel %vm87_vm1, %v571_v16, %v572_v15 }
 0x36c   :  { %v1203_v24 = vpack.c.bf16 %v569_v14, %v570_v20  ;;  %v1206_v25 = vpack.c.bf16 %v572_v15, %v573_v23  ;;  %v561_v30 = vsel %vm74_vm0, %v559_v26, %v560_v27  ;;  %v1003_v23 = vld [vmem:[%s1959_s7] sm:$0x1]  ;;  %s1603_s7 = smov [#allocation9]  }
 0x36d   :  { %1197 = vmatmul.mubr.msk.bf16.vlgmr.msra.gmra.mrb[8].mxu0 %vm1893_vm8, %v1196_v19  ;;  %v1200_v31 = vpack.c.bf16 %v561_v30, %v559_v26  ;;  %v1024_v26 = vld [vmem:[%s1960_s8] sm:$0x1]  ;;  %s1137_s8 = sshll.u32 %s1603_s7, 4  ;;  %s1138_s8 = int_to_ptr.vmem [resolvable:$true] %s1137_s8 }
 0x36e   :  { %1368 = vmatprep.mubr.msk.bf16.mxu1 %vm1202_vm9, %v1203_v24  ;;  %830 = vmatprep.mubr.bf16.mxu0 %v585_v21  ;;  %s1565_s10 = scalar_lea.vmem %s1138_s8, 512  ;;  %p1570_p3 = scmp.lt.s32.totalorder %s1138_s8, %s1138_s8 }
 0x36f   :  { %1369 = vmatmul.mubr.msk.bf16.vlgmr.msra.gmra.mrb[4].mxu1 %vm1202_vm9, %v1206_v25  ;;  %1438 = vmatpush3.bf16.msra.mxu0 %v1757_v52  ;;  %p1566_p2 = scmp.ne.s32.totalorder %s1138_s8, %s1565_s10  ;;  %p1571_p4 = scmp.lt.s32.totalorder %s1565_s10, %s1565_s10 }
 0x370   :  { %1439 = vmatprep.subr.bf16.mxu0 %v1598_v34  ;;  %1408 = vmatpush3.msra.mxu1 %v1859_v47 }
 0x371   :  { %1409 = vmatprep.mubr.msk.f32.mxu1 %vm1599_vm4, %v1600_v9  ;;  %p1572_p5 = por %p1571_p4, %p1570_p3 }
 0x373   :  { %1441 = vmatpush3.bf16.msra.mxu0 %v1767_v55  ;;  %p1573_p6 = pnand %p1572_p5, %p1566_p2 }
 0x374   :  { %1442 = vmatprep.subr.bf16.mxu0 %v1598_v34 }
 0x375   :  { %1201 = vmatmul.mubr.msk.bf16.gmra.mrb[12].mxu0 %vm1893_vm8, %v1200_v31 }
 0x376   :  { %1404 = vmatprep.mubr.msk.f32.mxu0 %vm1599_vm4, %v1600_v9 }
 0x377   :  { %1444 = vmatpush3.bf16.msra.mxu0 %v1777_v58 }
 0x378   :  { %1445 = vmatprep.subr.bf16.mxu0 %v1598_v34 }
 0x37b   :  { %1447 = vmatpush3.bf16.msra.mxu0 %v1787_v61 }
 0x37c   :  { %1448 = vmatprep.subr.bf16.mxu0 %v1598_v34 }
 0x37f   :  { %1450 = vmatpush3.bf16.msra.mxu0 %v1797_v0 }
 0x380   :  { %1451 = vmatprep.subr.bf16.mxu0 %v1598_v34 }
 0x383   :  { %1453 = vmatpush3.bf16.msra.mxu0 %v1807_v3 }
 0x384   :  { %1454 = vmatprep.subr.bf16.mxu0 %v1598_v34 }
 0x387   :  { %1456 = vmatpush3.bf16.msra.mxu0 %v1817_v6 }
 0x388   :  { %1457 = vmatprep.subr.bf16.mxu0 %v1598_v34 }
 0x38b   :  { %1459 = vmatpush3.bf16.msra.mxu0 %v1828_v10 }
 0x440   :  { %v1271_v52 = vpop.f32.mrb[8].mxu0 }
 0x441   :  { %v1272_v55 = vpop.f32.mrb[9].mxu0 }
 0x442   :  { %v1273_v58 = vadd.f32 %v1272_v55, %v1271_v52  ;;  %v1370_v61 = vpop.f32.mrb[4].mxu1  ;;  %v1274_v9 = vpop.f32.mrb[10].mxu0 }
 0x443   :  { %v873_v47 = vpop.f32.mrb[5].mxu1  ;;  %v1275_v32 = vpop.f32.mrb[11].mxu0 }
 0x444   :  { %v874_v0 = vadd.f32 %v1273_v58, %v873_v47  ;;  %v1276_v33 = vadd.f32 %v1275_v32, %v1274_v9  ;;  %v1371_v35 = vpop.f32.mrb[6].mxu1 }
 0x445   :  { %v876_v36 = vpop.f32.mrb[7].mxu1 }
 0x446   :  { %v877_v3 = vadd.f32 %v1276_v33, %v876_v36  ;;  %v897_v41 = vmul.f32 %v874_v0, %v874_v0 }
 0x448   :  { %v1277_v37 = vpop.f32.mrb[12].mxu0  ;;  %v898_v39 = vmul.f32 %v877_v3, %v877_v3  ;;  %v888_v10 = vadd.f32 %v877_v3, %v874_v0 }
 0x449   :  { %v1278_v38 = vpop.f32.mrb[13].mxu0 }
 0x44a   :  { %v1279_v6 = vadd.f32 %v1278_v38, %v1277_v37  ;;  %v1280_v40 = vpop.f32.mrb[14].mxu0  ;;  %v901_v44 = vadd.f32 %v898_v39, %v897_v41 }
 0x44b   :  { %v1281_v34 = vpop.f32.mrb[15].mxu0 }
 0x44c   :  { %v882_v42 = vadd.f32 %v1370_v61, %v1279_v6  ;;  %v1282_v43 = vadd.f32 %v1281_v34, %v1280_v40 }
 0x44e   :  { %v889_v45 = vadd.f32 %v888_v10, %v882_v42  ;;  %v899_v46 = vmul.f32 %v882_v42, %v882_v42  ;;  %v885_v49 = vadd.f32 %v1371_v35, %v1282_v43 }
 0x450   :  { %v902_v50 = vadd.f32 %v901_v44, %v899_v46  ;;  %v890_v51 = vadd.f32 %v889_v45, %v885_v49  ;;  %v900_v53 = vmul.f32 %v885_v49, %v885_v49 }
 0x452   :  { %v891_v54 = vrot.slane %v890_v51, 4  ;;  %v903_v56 = vadd.f32 %v902_v50, %v900_v53 }
 0x454   :  { %v892_v57 = vadd.f32 %v891_v54, %v890_v51  ;;  %v904_v59 = vrot.slane %v903_v56, 4 }
 0x456   :  { %v893_v60 = vrot.slane %v892_v57, 2  ;;  %v905_v62 = vadd.f32 %v904_v59, %v903_v56 }
 0x458   :  { %v894_v63 = vadd.f32 %v893_v60, %v892_v57  ;;  %v906_v1 = vrot.slane %v905_v62, 2 }
 0x45a   :  { %v895_v2 = vrot.slane %v894_v63, 1  ;;  %v907_v4 = vadd.f32 %v906_v1, %v905_v62 }
 0x45c   :  { %v908_v5 = vrot.slane %v907_v4, 1  ;;  %v896_v7 = vadd.f32 %v895_v2, %v894_v63 }
 0x45e   :  { %v909_v8 = vadd.f32 %v908_v5, %v907_v4 }
 0x460   :  { %v910_v11 = vsel %vm74_vm0, %v896_v7, %v909_v8 }
 0x461   :  { %1405 = vmatmul.mubr.f32.vlgmr.msra.gmra.mrb[16].mxu0 %v910_v11 }
 0x534   :  { %v993_v12 = vpop.f32.mrb[16].mxu0 }
 0x535   :  { %v997_v13 = vmul.f32 0.001953125, %v993_v12  ;;  %v1406_v14 = vpop.f32.mrb[17].mxu0 }
 0x537   :  { %v998_v16 = vmul.f32 %v997_v13, %v997_v13 }
 0x539   :  { %v1000_v15 = vrot.slane %v998_v16, 7 }
 0x53b   :  { %v1002_v22 = vsub.f32 %v997_v13, %v1000_v15 }
 0x53d   :  { %v1004_v28 = vadd.f32 1e-05, %v1002_v22 }
 0x53f   :  { %1519 = vrsqrt.f32 %v1004_v28 }
 0x549   :  { %v1520_v19 = vpop.eup %1519 }
 0x54a   :  { %v1013_v20 = vrot.slane %v1520_v19, %v1865_v18 }
 0x54c   :  { %v1014_v21 = vcombine.high %v1013_v20, %v1013_v20 }
 0x54e   :  { %v1021_v24 = vrot.slane %v1014_v21, %v1865_v18 }
 0x550   :  { %v1023_v25 = vmul.f32 %v1021_v24, %v1003_v23 }
 0x552   :  { %v1025_v27 = vmul.f32 %v1023_v25, %v997_v13 }
 0x554   :  { %v1026_v30 = vsub.f32 %v1024_v26, %v1025_v27 }
 0x556   :  { %v1031_v31 = vrot.slane %v1026_v30, %v1876_v29 }
 0x558   :  { %v1033_v52 = vsel %vm74_vm0, %v1023_v25, %v1031_v31 }
 0x559   :  { %1410 = vmatmul.mubr.msk.f32.vlgmr.msra.gmra.mrb[8].mxu1 %vm458_vm5, %v1033_v52 }
 0x62c   :  { %v1104_v55 = vpop.f32.mrb[8].mxu1 }
 0x62d   :  { %v1111_v58 = vrot.slane %v1104_v55, %v1876_v29  ;;  %v1411_v61 = vpop.f32.mrb[9].mxu1  ;;  %v1119_v18 = vrot.slane %v1104_v55, %v542_v48 }
 0x62f   :  { %v1112_v9 = vmul.f32 %v1111_v58, %v874_v0  ;;  %v1113_v47 = vmul.f32 %v1111_v58, %v877_v3  ;;  %v1114_v32 = vmul.f32 %v1111_v58, %v882_v42  ;;  %v1115_v33 = vmul.f32 %v1111_v58, %v885_v49 }
 0x631   :  { %v1120_v35 = vadd.f32 %v1119_v18, %v1112_v9  ;;  %v1121_v36 = vadd.f32 %v1119_v18, %v1113_v47  ;;  %v1122_v37 = vadd.f32 %v1119_v18, %v1114_v32  ;;  %v1123_v38 = vadd.f32 %v1119_v18, %v1115_v33 }
 0x633   :  { %v1124_v39 = vmax.f32 %v1120_v35, 0.0  ;;  %v1125_v6 = vmax.f32 %v1121_v36, 0.0  ;;  %v1126_v40 = vmax.f32 %v1122_v37, 0.0  ;;  %v1127_v34 = vmax.f32 %v1123_v38, 0.0 }
 0x635   :  { %1128 = vst [vmem:[#allocation9] sm:$0xff] %v1124_v39  ;;  %1129 = vst [vmem:[#allocation9 + $0x8] sm:$0xff] %v1125_v6 }
 0x636   :  { %1130 = vst [vmem:[#allocation9 + $0x10] sm:$0xff] %v1126_v40  ;;  %1131 = vst [vmem:[#allocation9 + $0x18] sm:$0xff] %v1127_v34 }
 0x637   :  { %1576 = shalt.err (!%p1573_p6)
}
 0x638   :  { %s1577_s15 = scalar_lea.hbm %s1961_s9, 512 }
 0x639   :  { %p1578_p7 = scmp.ne.s32.totalorder %s1961_s9, %s1577_s15  ;;  %p1581_p8 = scmp.lt.u32.totalorder %s1577_s15, %s1961_s9 }
 0x63b   :  { %p1583_p9 = pnand %p1581_p8, %p1578_p7 }
 0x63d   :  { %1586 = shalt.err (!%p1583_p9)
}
 0x63e   :  { %s1604_s20 = smov 128   ;;  %s1605_s21 = smov 8  }
 0x63f   :  { %1143 = dma.vmem_to_hbm [thread:$0]  %s1138_s8, 512, %s1961_s9, [#allocation6], %s1604_s20, %s1604_s20, %s1605_s21  }
 0x640   :  { %1591 = dma.done.wait [#allocation6], 512  }
 0x641   :  { %1592 = vsyncadd [#allocation6], 4294966784 }
 0x642   :  { %1147 = vsyncpa [#allocation5], 1 }
 0x643   :  { %1148 = vsyncpa [#allocation8], 1 }
 0x644   :  { %1149 = vsyncpa [#allocation6], 1 }

</bundles_post_ra>
